<compile_context>
chip_gen: v5e
topology: v5e:2x2
jax: 0.10.0
libtpu: 0.0.40
codegen_flags: <defaults>
</compile_context>

<pallas_src>
import jax
import jax.numpy as jnp
from jax.experimental import pallas as pl
from jax.experimental.pallas import tpu as pltpu


# ---------------------------------------------------------------------------
# Fused Pallas kernel
# ---------------------------------------------------------------------------
def _make_fused_encoder_kernel(n_layers, embedding_dim):
    """Build a kernel closure for `n_layers` hidden layers + fused heads.

    Ref order: x, (w0, b0), ..., (w_{L-1}, b_{L-1}), w_heads, b_heads, out.
    """

    def kernel(x_ref, *refs):
        out_ref = refs[-1]
        E = embedding_dim

        # Hidden stack: feature = relu(feature @ W + b), fully VMEM/vreg resident.
        f = x_ref[...]
        for layer in range(n_layers):
            w = refs[2 * layer][...]
            b = refs[2 * layer + 1][...]          # (1, out) f32 -> broadcasts over batch
            acc = jnp.dot(f.astype(w.dtype), w,
                          preferred_element_type=jnp.float32) + b
            f = jnp.maximum(acc, 0.0)             # f32 on the VPU

        # Fused heads: one MXU matmul produces [mu | logvar] = f @ [W1|W2] + [b1|b2].
        wh = refs[2 * n_layers][...]               # (dim, 2*E)
        bh = refs[2 * n_layers + 1][...]           # (1, 2*E) f32
        hd = jnp.dot(f.astype(wh.dtype), wh,
                     preferred_element_type=jnp.float32) + bh

        std = jnp.exp(0.5 * hd[:, E:])             # EUP op (free slot)

        # Direct slice stores into the packed [mu | logvar | std] slab
        # (no in-kernel concat copy).
        out_ref[:, : 2 * E] = hd.astype(out_ref.dtype)
        out_ref[:, 2 * E:] = std.astype(out_ref.dtype)

    return kernel


# ---------------------------------------------------------------------------
# Tile selection
# ---------------------------------------------------------------------------
def _choose_tile_b(B, D, hidden_dims, E, max_tile_b):
    """Pick a batch tile: large (amortize grid overhead), multiple of 8
    sublanes, >= 2 grid steps for large B (v7x megacore), VMEM-bounded."""
    if B <= 8:
        # Block dims equal to the full array satisfy the (8, 128) rule even
        # when B is not a multiple of 8.
        return B
    t = min(max_tile_b, pl.cdiv(B, 2))   # aim for >= 2 grid steps
    # Keep double-buffered x/out blocks + activations well inside the
    # default ~32 MiB scoped VMEM limit (conservative f32 accounting).
    row_bytes = 4 * (2 * D + 2 * 3 * E + sum(hidden_dims) + 3 * E)
    t = min(t, max(8, (24 * 1024 * 1024) // max(row_bytes, 1)))
    return max(8, (t // 8) * 8)


# ---------------------------------------------------------------------------
# Wrapper: single fused pallas_call, batch-tiled grid (no wrapper-side pad)
# ---------------------------------------------------------------------------
def encoder_forward(params, x, *, max_tile_b=8192, io_dtype=None,
                    return_packed=False):
    """Fused encoder forward: returns (mu, std, logvar).

    io_dtype: optionally jnp.bfloat16 on v6e/v7x to halve streaming HBM
    traffic (MXU still accumulates in f32).  Default: x.dtype (f32-safe for
    v5e and exact vs. the reference).
    """
    seq = params["seq"]
    w1, b1 = params["fc1"]
    w2, b2 = params["fc2"]
    E = w1.shape[1]

    io_dtype = x.dtype if io_dtype is None else io_dtype

    # Fused head weights/biases (wrapper-time layout plumbing, tiny).
    wh = jnp.concatenate([w1, w2], axis=1).astype(io_dtype)     # (dim, 2*E)
    bh = jnp.concatenate([b1, b2]).reshape(1, 2 * E).astype(jnp.float32)

    B, D = x.shape
    hidden_dims = [w.shape[1] for w, _ in seq]

    tile_b = _choose_tile_b(B, D, hidden_dims, E, max_tile_b)
    grid = (pl.cdiv(B, tile_b),)   # partial last block handled by Pallas masking

    inputs = [x.astype(io_dtype)]
    in_specs = [pl.BlockSpec((tile_b, D), lambda i: (i, 0))]
    for (w, b) in seq:
        wc = w.astype(io_dtype)
        b2d = b.reshape(1, -1).astype(jnp.float32)
        inputs += [wc, b2d]
        # Constant block index -> weights/biases stay VMEM-resident across steps.
        in_specs += [
            pl.BlockSpec(wc.shape, lambda i: (0, 0)),
            pl.BlockSpec(b2d.shape, lambda i: (0, 0)),
        ]
    inputs += [wh, bh]
    in_specs += [
        pl.BlockSpec(wh.shape, lambda i: (0, 0)),
        pl.BlockSpec(bh.shape, lambda i: (0, 0)),
    ]

    out_spec = pl.BlockSpec((tile_b, 3 * E), lambda i: (i, 0))

    packed = pl.pallas_call(
        _make_fused_encoder_kernel(len(seq), E),
        out_shape=jax.ShapeDtypeStruct((B, 3 * E), io_dtype),
        grid=grid,
        in_specs=in_specs,
        out_specs=out_spec,
        compiler_params=pltpu.CompilerParams(
            dimension_semantics=("parallel",),   # megacore sharding on v7x
        ),
    )(*inputs)

    if return_packed:
        return packed
    mu = packed[:, :E]
    logvar = packed[:, E:2 * E]
    std = packed[:, 2 * E:]
    return mu, std, logvar


# ---------------------------------------------------------------------------
# Parameter init (PyTorch nn.Linear default: U(-1/sqrt(fan_in), 1/sqrt(fan_in)))
# ---------------------------------------------------------------------------
def init_encoder_params(key, data_dim, compress_dims, embedding_dim):
    params = {"seq": []}
    dim = data_dim
    for item in compress_dims:
        key, kw, kb = jax.random.split(key, 3)
        bound = 1.0 / jnp.sqrt(dim)
        w = jax.random.uniform(kw, (dim, item), jnp.float32, -bound, bound)
        b = jax.random.uniform(kb, (item,), jnp.float32, -bound, bound)
        params["seq"].append((w, b))
        dim = item
    for name in ("fc1", "fc2"):
        key, kw, kb = jax.random.split(key, 3)
        bound = 1.0 / jnp.sqrt(dim)
        w = jax.random.uniform(kw, (dim, embedding_dim), jnp.float32, -bound, bound)
        b = jax.random.uniform(kb, (embedding_dim,), jnp.float32, -bound, bound)
        params[name] = (w, b)
    return params


def encoder_reference(params, x):
    """Pure-JAX reference for correctness checking."""
    feature = x
    for w, b in params["seq"]:
        feature = jnp.maximum(feature @ w + b, 0.0)
    w1, b1 = params["fc1"]
    w2, b2 = params["fc2"]
    mu = feature @ w1 + b1
    logvar = feature @ w2 + b2
    std = jnp.exp(0.5 * logvar)
    return mu, std, logvar


# ---------------------------------------------------------------------------
if __name__ == "__main__":
    data_dim = 32
    compress_dims = (64, 32)
    embedding_dim = 16

    key = jax.random.PRNGKey(0)
    key, kx1, kx2 = jax.random.split(key, 3)
    params = init_encoder_params(key, data_dim, compress_dims, embedding_dim)

    fwd = jax.jit(encoder_forward)

    # Case 1: small batch (single full-batch block).
    x_small = jax.random.normal(kx1, (8, data_dim), jnp.float32)
    mu, std, logvar = fwd(params, x_small)
    jax.block_until_ready((mu, std, logvar))
    mu_r, std_r, logvar_r = encoder_reference(params, x_small)
    assert jnp.allclose(mu, mu_r, atol=1e-5), "mu mismatch (small)"
    assert jnp.allclose(std, std_r, atol=1e-5), "std mismatch (small)"
    assert jnp.allclose(logvar, logvar_r, atol=1e-5), "logvar mismatch (small)"

    # Case 2: batch not a multiple of the tile -> multi-step grid with a
    # masked partial last block (exercises the no-pad path).
    x_big = jax.random.normal(kx2, (100, data_dim), jnp.float32)
    mu, std, logvar = fwd(params, x_big)
    jax.block_until_ready((mu, std, logvar))
    mu_r, std_r, logvar_r = encoder_reference(params, x_big)
    assert jnp.allclose(mu, mu_r, atol=1e-5), "mu mismatch (big)"
    assert jnp.allclose(std, std_r, atol=1e-5), "std mismatch (big)"
    assert jnp.allclose(logvar, logvar_r, atol=1e-5), "logvar mismatch (big)"

    print("KERNEL_OK")
</pallas_src>

<mosaic_0001>
module attributes {stable_mosaic.version = 11 : i64} {
  func.func @kernel(%arg0: i32, %arg1: memref<8x32xf32, #tpu.memory_space<vmem>>, %arg2: memref<32x64xf32, #tpu.memory_space<vmem>>, %arg3: memref<1x64xf32, #tpu.memory_space<vmem>>, %arg4: memref<64x32xf32, #tpu.memory_space<vmem>>, %arg5: memref<1x32xf32, #tpu.memory_space<vmem>>, %arg6: memref<32x32xf32, #tpu.memory_space<vmem>>, %arg7: memref<1x32xf32, #tpu.memory_space<vmem>>, %arg8: memref<8x48xf32, #tpu.memory_space<vmem>>) attributes {dimension_semantics = [#tpu.dimension_semantics<parallel>], iteration_bounds = array<i64: 1>, scalar_prefetch = 0 : i64, scratch_operands = 0 : i64, tpu.core_type = #tpu.core_type<tc>, window_params = [{transform_indices = @transform_0, window_bounds = array<i64: 8, 32>}, {pipeline_mode = #tpu.pipeline_mode<synchronous>, transform_indices = @transform_1, window_bounds = array<i64: 32, 64>}, {pipeline_mode = #tpu.pipeline_mode<synchronous>, transform_indices = @transform_2, window_bounds = array<i64: 1, 64>}, {pipeline_mode = #tpu.pipeline_mode<synchronous>, transform_indices = @transform_3, window_bounds = array<i64: 64, 32>}, {pipeline_mode = #tpu.pipeline_mode<synchronous>, transform_indices = @transform_4, window_bounds = array<i64: 1, 32>}, {pipeline_mode = #tpu.pipeline_mode<synchronous>, transform_indices = @transform_5, window_bounds = array<i64: 32, 32>}, {pipeline_mode = #tpu.pipeline_mode<synchronous>, transform_indices = @transform_6, window_bounds = array<i64: 1, 32>}, {transform_indices = @transform_7, window_bounds = array<i64: 8, 48>}]} {
    %c0 = arith.constant 0 : index
    %c0_0 = arith.constant 0 : index
    %0 = vector.load %arg1[%c0, %c0_0] : memref<8x32xf32, #tpu.memory_space<vmem>>, vector<8x32xf32>
    %c0_1 = arith.constant 0 : index
    %c0_2 = arith.constant 0 : index
    %1 = vector.load %arg2[%c0_1, %c0_2] : memref<32x64xf32, #tpu.memory_space<vmem>>, vector<32x64xf32>
    %c0_3 = arith.constant 0 : index
    %c0_4 = arith.constant 0 : index
    %2 = vector.load %arg3[%c0_3, %c0_4] : memref<1x64xf32, #tpu.memory_space<vmem>>, vector<1x64xf32>
    %cst = arith.constant dense<0.000000e+00> : vector<8x64xf32>
    %3 = tpu.matmul %0, %1, %cst {dimension_numbers = #tpu.dot_dimension_numbers<[1], [0], [0], [1], [0, 0, 1, 1], [], []>} : vector<8x32xf32>, vector<32x64xf32>, vector<8x64xf32> -> vector<8x64xf32>
    %4 = vector.broadcast %2 : vector<1x64xf32> to vector<8x64xf32>
    %5 = arith.addf %3, %4 : vector<8x64xf32>
    %cst_5 = arith.constant 0.000000e+00 : f32
    %6 = vector.broadcast %cst_5 : f32 to vector<8x64xf32>
    %7 = arith.maximumf %5, %6 : vector<8x64xf32>
    %c0_6 = arith.constant 0 : index
    %c0_7 = arith.constant 0 : index
    %8 = vector.load %arg4[%c0_6, %c0_7] : memref<64x32xf32, #tpu.memory_space<vmem>>, vector<64x32xf32>
    %c0_8 = arith.constant 0 : index
    %c0_9 = arith.constant 0 : index
    %9 = vector.load %arg5[%c0_8, %c0_9] : memref<1x32xf32, #tpu.memory_space<vmem>>, vector<1x32xf32>
    %cst_10 = arith.constant dense<0.000000e+00> : vector<8x32xf32>
    %10 = tpu.matmul %7, %8, %cst_10 {dimension_numbers = #tpu.dot_dimension_numbers<[1], [0], [0], [1], [0, 0, 1, 1], [], []>} : vector<8x64xf32>, vector<64x32xf32>, vector<8x32xf32> -> vector<8x32xf32>
    %11 = vector.broadcast %9 : vector<1x32xf32> to vector<8x32xf32>
    %12 = arith.addf %10, %11 : vector<8x32xf32>
    %cst_11 = arith.constant 0.000000e+00 : f32
    %13 = vector.broadcast %cst_11 : f32 to vector<8x32xf32>
    %14 = arith.maximumf %12, %13 : vector<8x32xf32>
    %c0_12 = arith.constant 0 : index
    %c0_13 = arith.constant 0 : index
    %15 = vector.load %arg6[%c0_12, %c0_13] : memref<32x32xf32, #tpu.memory_space<vmem>>, vector<32x32xf32>
    %c0_14 = arith.constant 0 : index
    %c0_15 = arith.constant 0 : index
    %16 = vector.load %arg7[%c0_14, %c0_15] : memref<1x32xf32, #tpu.memory_space<vmem>>, vector<1x32xf32>
    %cst_16 = arith.constant dense<0.000000e+00> : vector<8x32xf32>
    %17 = tpu.matmul %14, %15, %cst_16 {dimension_numbers = #tpu.dot_dimension_numbers<[1], [0], [0], [1], [0, 0, 1, 1], [], []>} : vector<8x32xf32>, vector<32x32xf32>, vector<8x32xf32> -> vector<8x32xf32>
    %18 = vector.broadcast %16 : vector<1x32xf32> to vector<8x32xf32>
    %19 = arith.addf %17, %18 : vector<8x32xf32>
    %20 = vector.extract_strided_slice %19 {offsets = [0, 16], sizes = [8, 16], strides = [1, 1]} : vector<8x32xf32> to vector<8x16xf32>
    %cst_17 = arith.constant 5.000000e-01 : f32
    %21 = vector.broadcast %cst_17 : f32 to vector<8x16xf32>
    %22 = arith.mulf %21, %20 : vector<8x16xf32>
    %23 = math.exp %22 : vector<8x16xf32>
    %c0_18 = arith.constant 0 : index
    %c0_19 = arith.constant 0 : index
    %24 = vector.load %arg8[%c0_18, %c0_19] : memref<8x48xf32, #tpu.memory_space<vmem>>, vector<8x32xf32>
    tpu.vector_store %arg8[%c0_18, %c0_19], %19 {strides = array<i32>} : memref<8x48xf32, #tpu.memory_space<vmem>>, vector<8x32xf32>,
    %c0_20 = arith.constant 0 : index
    %c32 = arith.constant 32 : index
    %25 = vector.load %arg8[%c0_20, %c32] : memref<8x48xf32, #tpu.memory_space<vmem>>, vector<8x16xf32>
    tpu.vector_store %arg8[%c0_20, %c32], %23 {strides = array<i32>} : memref<8x48xf32, #tpu.memory_space<vmem>>, vector<8x16xf32>,
    return
  }
  func.func @transform_0(%arg0: i32) -> (i32, i32) {
    %c0_i32 = arith.constant 0 : i32
    %c0_i32_0 = arith.constant 0 : i32
    return %arg0, %c0_i32 : i32, i32
  }
  func.func @transform_1(%arg0: i32) -> (i32, i32) {
    %c0_i32 = arith.constant 0 : i32
    %c0_i32_0 = arith.constant 0 : i32
    %c0_i32_1 = arith.constant 0 : i32
    return %c0_i32, %c0_i32_0 : i32, i32
  }
  func.func @transform_2(%arg0: i32) -> (i32, i32) {
    %c0_i32 = arith.constant 0 : i32
    %c0_i32_0 = arith.constant 0 : i32
    %c0_i32_1 = arith.constant 0 : i32
    return %c0_i32, %c0_i32_0 : i32, i32
  }
  func.func @transform_3(%arg0: i32) -> (i32, i32) {
    %c0_i32 = arith.constant 0 : i32
    %c0_i32_0 = arith.constant 0 : i32
    %c0_i32_1 = arith.constant 0 : i32
    return %c0_i32, %c0_i32_0 : i32, i32
  }
  func.func @transform_4(%arg0: i32) -> (i32, i32) {
    %c0_i32 = arith.constant 0 : i32
    %c0_i32_0 = arith.constant 0 : i32
    %c0_i32_1 = arith.constant 0 : i32
    return %c0_i32, %c0_i32_0 : i32, i32
  }
  func.func @transform_5(%arg0: i32) -> (i32, i32) {
    %c0_i32 = arith.constant 0 : i32
    %c0_i32_0 = arith.constant 0 : i32
    %c0_i32_1 = arith.constant 0 : i32
    return %c0_i32, %c0_i32_0 : i32, i32
  }
  func.func @transform_6(%arg0: i32) -> (i32, i32) {
    %c0_i32 = arith.constant 0 : i32
    %c0_i32_0 = arith.constant 0 : i32
    %c0_i32_1 = arith.constant 0 : i32
    return %c0_i32, %c0_i32_0 : i32, i32
  }
  func.func @transform_7(%arg0: i32) -> (i32, i32) {
    %c0_i32 = arith.constant 0 : i32
    %c0_i32_0 = arith.constant 0 : i32
    return %arg0, %c0_i32 : i32, i32
  }
}

</mosaic_0001>

<bundles_post_ra>
// kernel: encoder_forward.1
= control target key start
LH: loop header
LB: loop body
LE: loop exit
PB: predicated region body
PF: predicated region fallthrough
CT: control target
= control target key end

     0   :  { %vm35_vm0 = vcmask 261120   ;;  %vm72_vm1 = vcmask 523264   ;;  %vm136_vm2 = vcmask 392448   ;;  %s261_s1 = inlined_call_operand.vmem [shape: f32[32,64], index: 1, kind: input, shape index: {}]   ;;  %s262_s3 = inlined_call_operand.vmem [shape: f32[64,32], index: 3, kind: input, shape index: {}]   ;;  %s263_s0 = inlined_call_operand.vmem [shape: f32[8,32], index: 0, kind: input, shape index: {}]   ;;  %s264_s2 = inlined_call_operand.vmem [shape: f32[1,64], index: 2, kind: input, shape index: {}]   ;;  %s265_s4 = inlined_call_operand.vmem [shape: f32[1,32], index: 4, kind: input, shape index: {}]   ;;  %s266_s5 = inlined_call_operand.vmem [shape: f32[32,32], index: 5, kind: input, shape index: {}]   ;;  %s267_s6 = inlined_call_operand.vmem [shape: f32[1,32], index: 6, kind: input, shape index: {}]   ;;  %s268_s7 = inlined_call_operand.vmem [shape: f32[8,48], index: 7, kind: output, shape index: {}]  }
   0x1   :  { %v30_v0 = vld [vmem:[%s261_s1 + $0x18] sm:$0xff]  ;;  %v29_v1 = vld [vmem:[%s261_s1 + $0x10] sm:$0xff]  ;;  %v28_v3 = vld [vmem:[%s261_s1 + $0x8] sm:$0xff] }
   0x2   :  { %51 = vmatpush.msra.mxu0 %v30_v0  ;;  %v67_v2 = vld [vmem:[%s262_s3 + $0x38] sm:$0xff]  ;;  %v66_v4 = vld [vmem:[%s262_s3 + $0x30] sm:$0xff]  ;;  %v65_v5 = vld [vmem:[%s262_s3 + $0x28] sm:$0xff] }
   0x3   :  { %84 = vmatpush.msra.mxu1 %v67_v2  ;;  %v27_v6 = vld [vmem:[%s261_s1] sm:$0xff]  ;;  %v63_v9 = vld [vmem:[%s262_s3 + $0x18] sm:$0xff]  ;;  %v62_v10 = vld [vmem:[%s262_s3 + $0x10] sm:$0xff] }
   0x4   :  { %52 = vmatpush.msra.mxu0 %v29_v1  ;;  %v26_v7 = vld [vmem:[%s263_s0] sm:$0xff]  ;;  %v61_v11 = vld [vmem:[%s262_s3 + $0x8] sm:$0xff]  ;;  %v100_v13 = vld [vmem:[%s266_s5 + $0x18] sm:$0xff] }
   0x5   :  { %85 = vmatpush.msra.mxu1 %v66_v4  ;;  %v64_v8 = vld [vmem:[%s262_s3 + $0x20] sm:$0xff]  ;;  %120 = vmatpush.msra.mxu2 %v100_v13  ;;  %v99_v18 = vld [vmem:[%s266_s5 + $0x10] sm:$0xff]  ;;  %v98_v19 = vld [vmem:[%s266_s5 + $0x8] sm:$0xff] }
   0x6   :  { %53 = vmatpush.msra.mxu0 %v28_v3  ;;  %v60_v12 = vld [vmem:[%s262_s3] sm:$0xff] }
   0x7   :  { %86 = vmatpush.msra.mxu1 %v65_v5  ;;  %v146_v14 = vld [vmem:[%s264_s2] ss:$0 sm:$0xff]  ;;  %121 = vmatpush.msra.mxu2 %v99_v18 }
   0x8   :  { %54 = vmatpush.msra.mxu0 %v27_v6  ;;  %v97_v20 = vld [vmem:[%s266_s5] sm:$0xff] }
   0x9   :  { %142 = vmatmul.msk.f32.vlgmr.msra.gmra.mxu0 %vm35_vm0, %v26_v7  ;;  %87 = vmatpush.msra.mxu1 %v64_v8  ;;  %v147_v21 = vld [vmem:[%s265_s4] ss:$0 sm:$0xff]  ;;  %s151_s4 = smov 16  }
   0xa   :  { %122 = vmatpush.msra.mxu2 %v98_v19  ;;  %v148_v25 = vld [vmem:[%s267_s6] ss:$0 sm:$0xff] }
   0xb   :  { %88 = vmatpush.msra.mxu1 %v63_v9 }
   0xc   :  { %123 = vmatpush.msra.mxu2 %v97_v20 }
   0xd   :  { %89 = vmatpush.msra.mxu1 %v62_v10 }
   0xf   :  { %90 = vmatpush.msra.mxu1 %v61_v11 }
  0x11   :  { %91 = vmatpush.msra.mxu1 %v60_v12 }
  0x86   :  { %v56_v15 = vpop.f32.mrf.mxu0 }
  0x87   :  { %v57_v16 = vadd.f32 %v146_v14, %v56_v15 }
  0x89   :  { %v59_v17 = vmax.f32 %v57_v16, 0.0 }
  0x8b   :  { %143 = vmatmul.msk.f32.vlgmr.msra.gmra.mxu1 %vm72_vm1, %v59_v17 }
 0x108   :  { %v93_v22 = vpop.f32.mrf.mxu1 }
 0x109   :  { %v94_v23 = vadd.f32 %v147_v21, %v93_v22 }
 0x10b   :  { %v96_v24 = vmax.f32 %v94_v23, 0.0 }
 0x10d   :  { %144 = vmatmul.msk.f32.vlgmr.msra.gmra.mxu2 %vm35_vm0, %v96_v24 }
 0x190   :  { %v125_v26 = vpop.f32.mrf.mxu2 }
 0x191   :  { %v126_v27 = vadd.f32 %v148_v25, %v125_v26 }
 0x193   :  { %v128_v28 = vmul.f32 0.5, %v126_v27  ;;  %131 = vst.msk [vmem:[%s268_s7] sm:$0xff] %vm35_vm0, %v126_v27 }
 0x195   :  { %v129_v29 = vmul.f32 1.442695, %v128_v28 }
 0x197   :  { %149 = vpow2.f32 %v129_v29 }
 0x19d   :  { %v150_v30 = vpop.eup %149 }
 0x19e   :  { %133 = vrot.lane.b32.xlu0 %v150_v30, %s151_s4 }
 0x210   :  { %v134_v31 = vpop.permute.xlu0 %133 }
 0x211   :  { %137 = vst.msk [vmem:[%s268_s7] sm:$0xff] %vm136_vm2, %v134_v31 }

</bundles_post_ra>
